<compile_context>
chip_gen: v7x
topology: tpu7x:2x2x1
jax: 0.10.0
libtpu: 0.0.40
codegen_flags: <defaults>
</compile_context>

<pallas_src>
import jax
import jax.numpy as jnp
from jax import lax
from jax.experimental import pallas as pl
from jax.experimental.pallas import tpu as pltpu


def _fclayer_kernel(x_ref, w_ref, b_ref, o_ref, v_ref, cur_ref):
    # Grid = (N/tn, OUT/to, T/tb).
    # INVARIANT: the time axis MUST remain the innermost ("arbitrary") grid
    # axis.  v_ref is a per-(n, o)-tile recurrence carried across consecutive
    # time blocks and is re-zeroed only at t == 0; reordering the grid would
    # silently corrupt the membrane state.
    t = pl.program_id(2)

    @pl.when(t == 0)
    def _():
        v_ref[...] = jnp.zeros_like(v_ref)

    tb, tn, k = x_ref.shape
    to = o_ref.shape[-1]

    # One MXU matmul for all tb time steps: (tb*tn, IN) @ (IN, to) -> f32.
    # x arrives in its native dtype and is cast to the compute dtype here (on
    # the VPU), avoiding a separate XLA convert pass over [T, N, IN] in HBM.
    # The (tb, tn, IN) -> (tb*tn, IN) collapse is a free view because tn is a
    # multiple of the f32 sublane tile (8).
    x2 = x_ref[...].reshape(tb * tn, k).astype(w_ref.dtype)
    cur = jnp.dot(x2, w_ref[...], preferred_element_type=jnp.float32)
    # TODO(synk): on v7x (VPU-bound regime) fold the bias into the matmul by
    # appending a ones column to x / a bias row to W to delete this f32 pass.
    cur_ref[...] = (cur + b_ref[...]).reshape(tb, tn, to)

    # Sequential IF-neuron update on the VPU.  fori_loop(unroll=True) bounds
    # the per-iteration live set (one (tn, to) slice of cur + one spike tile)
    # instead of keeping all tb steps' temporaries live at once.
    def step(i, v):
        v = v + cur_ref[i]
        fired = v >= 1.0                                  # v_threshold = 1.0
        o_ref[i] = jnp.where(fired, 1.0, 0.0).astype(o_ref.dtype)
        return jnp.where(fired, 0.0, v)                   # hard reset to 0.0

    v_ref[...] = lax.fori_loop(0, tb, step, v_ref[...], unroll=True)


def _largest_divisor_leq(n, cap):
    for d in range(min(n, cap), 0, -1):
        if n % d == 0:
            return d
    return 1


def _pick_tn(n, tb, in_f, to, out_bytes, budget_bytes):
    """Largest multiple-of-8 divisor of n whose double-buffered footprint fits;
    prefers <= n//2 so two 'parallel' N-tiles exist (v7x megacore)."""
    cands = sorted((d for d in range(8, n + 1, 8) if n % d == 0), reverse=True)

    def footprint(tn):
        return (2 * tb * tn * in_f * 4            # x blocks (f32, double-buffered)
                + 2 * tb * tn * to * out_bytes    # out blocks (double-buffered)
                + 2 * in_f * to * 2               # W tile (bf16, double-buffered)
                + 2 * to * 4                      # bias tile
                + tn * to * 4                     # v scratch (f32)
                + tb * tn * to * 4)               # cur scratch (f32)

    for tn in cands:                              # prefer >= 2 N-tiles
        if tn <= n // 2 and footprint(tn) <= budget_bytes:
            return tn
    for tn in cands:
        if footprint(tn) <= budget_bytes:
            return tn
    return cands[-1] if cands else n


def fclayer_forward(x, w, b, *, tb=None, tn=None, to=None,
                    compute_dtype=jnp.bfloat16, out_dtype=jnp.bfloat16,
                    vmem_limit_bytes=48 * 1024 * 1024):
    """x: [T, N, IN] f32, w: [IN, OUT] f32, b: [OUT] f32 -> [T, N, OUT] spikes.

    compute_dtype=jnp.float32 gives exact SpikingJelly/PyTorch forward
    semantics; bf16 (default) is the faster inference-precision trade-off.
    """
    T, N, IN = x.shape
    OUT = w.shape[1]

    # Keep the whole weight resident by default so x is never re-read from HBM
    # for additional output tiles.  Split OUT only if explicitly requested.
    to = OUT if to is None else to
    tb = _largest_divisor_leq(T, 16) if tb is None else tb
    out_bytes = jnp.dtype(out_dtype).itemsize
    if tn is None:
        tn = _pick_tn(N, tb, IN, to, out_bytes, int(0.8 * vmem_limit_bytes))

    assert T % tb == 0 and N % tn == 0 and OUT % to == 0, \
        "pad T/N/OUT to tile multiples"
    # Lane density on the MXU K/N dims and free (tb,tn,IN)->(tb*tn,IN) reshape
    # (f32 sublane tile = 8).  On v6e/v7x prefer to % 256 == 0 and tb*tn >= 256.
    assert IN % 128 == 0 and to % 128 == 0 and tn % 8 == 0, \
        "pad IN / OUT-tile to 128 lanes and batch tile to a multiple of 8"

    wc = w.astype(compute_dtype)                  # small; boundary cast is fine
    b2 = b.reshape(1, OUT).astype(jnp.float32)

    grid = (N // tn, OUT // to, T // tb)          # time innermost (recurrence)

    return pl.pallas_call(
        _fclayer_kernel,
        out_shape=jax.ShapeDtypeStruct((T, N, OUT), out_dtype),
        grid_spec=pltpu.PrefetchScalarGridSpec(
            num_scalar_prefetch=0,
            grid=grid,
            in_specs=[
                # x index_map has no `o` dependence: with to == OUT (single
                # o-tile) the activation is streamed from HBM exactly once.
                pl.BlockSpec((tb, tn, IN), lambda n, o, t: (t, n, 0)),
                pl.BlockSpec((IN, to), lambda n, o, t: (0, o)),
                pl.BlockSpec((1, to), lambda n, o, t: (0, o)),
            ],
            out_specs=pl.BlockSpec((tb, tn, to), lambda n, o, t: (t, n, o)),
            scratch_shapes=[
                pltpu.VMEM((tn, to), jnp.float32),       # membrane potential v
                pltpu.VMEM((tb, tn, to), jnp.float32),   # f32 cur block
            ],
        ),
        compiler_params=pltpu.CompilerParams(
            # N / OUT tiles are independent (megacore-shardable); time carries
            # the membrane recurrence and must stay "arbitrary" + innermost.
            dimension_semantics=("parallel", "parallel", "arbitrary"),
            vmem_limit_bytes=vmem_limit_bytes,
        ),
    )(x, wc, b2)


def _reference(x, w, b, compute_dtype=jnp.bfloat16):
    """Pure-JAX reference (same matmul precision, f32 IF update)."""
    cur = jnp.einsum(
        "tni,io->tno",
        x.astype(compute_dtype), w.astype(compute_dtype),
        preferred_element_type=jnp.float32,
    ) + b.astype(jnp.float32)
    T = x.shape[0]
    v = jnp.zeros(cur.shape[1:], jnp.float32)
    outs = []
    for t in range(T):
        v = v + cur[t]
        fired = v >= 1.0
        outs.append(jnp.where(fired, 1.0, 0.0))
        v = jnp.where(fired, 0.0, v)
    return jnp.stack(outs, axis=0)


if __name__ == "__main__":
    # Small but hardware-friendly shapes: lane dims are 128-multiples, the
    # batch dim splits into two multiple-of-8 tiles, T is a multiple of tb.
    T, N, IN_F, OUT_F = 8, 64, 128, 256

    key = jax.random.PRNGKey(0)
    kx, kw, kb = jax.random.split(key, 3)

    # torch.nn.Linear-style init: U(-1/sqrt(in), 1/sqrt(in)).
    bound = 1.0 / (IN_F ** 0.5)
    w = jax.random.uniform(kw, (IN_F, OUT_F), jnp.float32, -bound, bound)
    b = jax.random.uniform(kb, (OUT_F,), jnp.float32, -bound, bound)

    # Multi-step input [T, N, in_features].
    x = jax.random.normal(kx, (T, N, IN_F), jnp.float32)

    out = fclayer_forward(x, w, b)
    out = jax.block_until_ready(out)
    assert out.shape == (T, N, OUT_F)

    ref = _reference(x, w, b)

    # Spikes are exactly 0/1 in both paths; allow a tiny mismatch budget for
    # membrane values landing exactly on the threshold (bf16-operand rounding
    # is an intentional inference-precision trade-off; pass
    # compute_dtype=jnp.float32 for exact semantics).
    mismatch = jnp.mean((out.astype(jnp.float32) != ref).astype(jnp.float32))
    assert float(mismatch) <= 2e-3, f"spike mismatch fraction too high: {float(mismatch)}"

    print("KERNEL_OK")
</pallas_src>

<mosaic_0001>
module attributes {stable_mosaic.version = 11 : i64} {
  func.func @_fclayer_kernel(%arg0: i32, %arg1: i32, %arg2: i32, %arg3: memref<8x32x128xf32, #tpu.memory_space<vmem>>, %arg4: memref<128x256xbf16, #tpu.memory_space<vmem>>, %arg5: memref<1x256xf32, #tpu.memory_space<vmem>>, %arg6: memref<8x32x256xbf16, #tpu.memory_space<vmem>>, %arg7: memref<32x256xf32, #tpu.memory_space<vmem>>, %arg8: memref<8x32x256xf32, #tpu.memory_space<vmem>>) attributes {dimension_semantics = [#tpu.dimension_semantics<parallel>, #tpu.dimension_semantics<parallel>, #tpu.dimension_semantics<arbitrary>], iteration_bounds = array<i64: 2, 1, 1>, scalar_prefetch = 0 : i64, scratch_operands = 2 : i64, tpu.core_type = #tpu.core_type<tc>, window_params = [{transform_indices = @transform_0, window_bounds = array<i64: 8, 32, 128>}, {transform_indices = @transform_1, window_bounds = array<i64: 128, 256>}, {transform_indices = @transform_2, window_bounds = array<i64: 1, 256>}, {transform_indices = @transform_3, window_bounds = array<i64: 8, 32, 256>}]} {
    %c0_i32 = arith.constant 0 : i32
    %0 = arith.cmpi eq, %arg2, %c0_i32 : i32
    %1 = arith.extui %0 : i1 to i32
    %c0_i32_0 = arith.constant 0 : i32
    %2 = arith.cmpi ne, %1, %c0_i32_0 : i32
    scf.if %2 {
      %cst_79 = arith.constant 0.000000e+00 : f32
      %143 = vector.broadcast %cst_79 : f32 to vector<32x256xf32>
      %c0_80 = arith.constant 0 : index
      %c0_81 = arith.constant 0 : index
      %144 = vector.load %arg7[%c0_80, %c0_81] : memref<32x256xf32, #tpu.memory_space<vmem>>, vector<32x256xf32>
      tpu.vector_store %arg7[%c0_80, %c0_81], %143 {strides = array<i32>} : memref<32x256xf32, #tpu.memory_space<vmem>>, vector<32x256xf32>,
    } else {
    }
    %c0 = arith.constant 0 : index
    %c0_1 = arith.constant 0 : index
    %c0_2 = arith.constant 0 : index
    %3 = vector.load %arg3[%c0, %c0_1, %c0_2] : memref<8x32x128xf32, #tpu.memory_space<vmem>>, vector<8x32x128xf32>
    %4 = vector.shape_cast %3 : vector<8x32x128xf32> to vector<256x128xf32>
    %5 = arith.truncf %4 : vector<256x128xf32> to vector<256x128xbf16>
    %c0_3 = arith.constant 0 : index
    %c0_4 = arith.constant 0 : index
    %6 = vector.load %arg4[%c0_3, %c0_4] : memref<128x256xbf16, #tpu.memory_space<vmem>>, vector<128x256xbf16>
    %cst = arith.constant dense<0.000000e+00> : vector<256x256xf32>
    %7 = tpu.matmul %5, %6, %cst {dimension_numbers = #tpu.dot_dimension_numbers<[1], [0], [0], [1], [0, 0, 1, 1], [], []>} : vector<256x128xbf16>, vector<128x256xbf16>, vector<256x256xf32> -> vector<256x256xf32>
    %c0_5 = arith.constant 0 : index
    %c0_6 = arith.constant 0 : index
    %8 = vector.load %arg5[%c0_5, %c0_6] : memref<1x256xf32, #tpu.memory_space<vmem>>, vector<1x256xf32>
    %9 = vector.broadcast %8 : vector<1x256xf32> to vector<256x256xf32>
    %10 = arith.addf %7, %9 : vector<256x256xf32>
    %11 = vector.shape_cast %10 : vector<256x256xf32> to vector<8x32x256xf32>
    %c0_7 = arith.constant 0 : index
    %c0_8 = arith.constant 0 : index
    %c0_9 = arith.constant 0 : index
    %12 = vector.load %arg8[%c0_7, %c0_8, %c0_9] : memref<8x32x256xf32, #tpu.memory_space<vmem>>, vector<8x32x256xf32>
    tpu.vector_store %arg8[%c0_7, %c0_8, %c0_9], %11 {strides = array<i32>} : memref<8x32x256xf32, #tpu.memory_space<vmem>>, vector<8x32x256xf32>,
    %c0_10 = arith.constant 0 : index
    %c0_11 = arith.constant 0 : index
    %13 = vector.load %arg7[%c0_10, %c0_11] : memref<32x256xf32, #tpu.memory_space<vmem>>, vector<32x256xf32>
    %c0_i32_12 = arith.constant 0 : i32
    %14 = arith.index_cast %c0_i32_12 : i32 to index
    %c0_13 = arith.constant 0 : index
    %c0_14 = arith.constant 0 : index
    %15 = vector.load %arg8[%14, %c0_13, %c0_14] : memref<8x32x256xf32, #tpu.memory_space<vmem>>, vector<1x32x256xf32>
    %16 = vector.shape_cast %15 : vector<1x32x256xf32> to vector<32x256xf32>
    %17 = arith.addf %13, %16 : vector<32x256xf32>
    %cst_15 = arith.constant 1.000000e+00 : f32
    %18 = vector.broadcast %cst_15 : f32 to vector<32x256xf32>
    %19 = arith.cmpf oge, %17, %18 : vector<32x256xf32>
    %cst_16 = arith.constant 1.000000e+00 : f32
    %cst_17 = arith.constant 0.000000e+00 : f32
    %20 = vector.broadcast %cst_16 : f32 to vector<32x256xf32>
    %21 = vector.broadcast %cst_17 : f32 to vector<32x256xf32>
    %22 = arith.select %19, %20, %21 : vector<32x256xi1>, vector<32x256xf32>
    %23 = arith.truncf %22 : vector<32x256xf32> to vector<32x256xbf16>
    %24 = arith.index_cast %c0_i32_12 : i32 to index
    %c0_18 = arith.constant 0 : index
    %c0_19 = arith.constant 0 : index
    %25 = vector.load %arg6[%24, %c0_18, %c0_19] : memref<8x32x256xbf16, #tpu.memory_space<vmem>>, vector<1x32x256xbf16>
    %26 = vector.shape_cast %25 : vector<1x32x256xbf16> to vector<32x256xbf16>
    %27 = vector.shape_cast %23 : vector<32x256xbf16> to vector<1x32x256xbf16>
    tpu.vector_store %arg6[%24, %c0_18, %c0_19], %27 {strides = array<i32>} : memref<8x32x256xbf16, #tpu.memory_space<vmem>>, vector<1x32x256xbf16>,
    %cst_20 = arith.constant 0.000000e+00 : f32
    %28 = vector.broadcast %cst_20 : f32 to vector<32x256xf32>
    %29 = arith.select %19, %28, %17 : vector<32x256xi1>, vector<32x256xf32>
    %c1_i32 = arith.constant 1 : i32
    %30 = arith.index_cast %c1_i32 : i32 to index
    %c0_21 = arith.constant 0 : index
    %c0_22 = arith.constant 0 : index
    %31 = vector.load %arg8[%30, %c0_21, %c0_22] : memref<8x32x256xf32, #tpu.memory_space<vmem>>, vector<1x32x256xf32>
    %32 = vector.shape_cast %31 : vector<1x32x256xf32> to vector<32x256xf32>
    %33 = arith.addf %29, %32 : vector<32x256xf32>
    %cst_23 = arith.constant 1.000000e+00 : f32
    %34 = vector.broadcast %cst_23 : f32 to vector<32x256xf32>
    %35 = arith.cmpf oge, %33, %34 : vector<32x256xf32>
    %cst_24 = arith.constant 1.000000e+00 : f32
    %cst_25 = arith.constant 0.000000e+00 : f32
    %36 = vector.broadcast %cst_24 : f32 to vector<32x256xf32>
    %37 = vector.broadcast %cst_25 : f32 to vector<32x256xf32>
    %38 = arith.select %35, %36, %37 : vector<32x256xi1>, vector<32x256xf32>
    %39 = arith.truncf %38 : vector<32x256xf32> to vector<32x256xbf16>
    %40 = arith.index_cast %c1_i32 : i32 to index
    %c0_26 = arith.constant 0 : index
    %c0_27 = arith.constant 0 : index
    %41 = vector.load %arg6[%40, %c0_26, %c0_27] : memref<8x32x256xbf16, #tpu.memory_space<vmem>>, vector<1x32x256xbf16>
    %42 = vector.shape_cast %41 : vector<1x32x256xbf16> to vector<32x256xbf16>
    %43 = vector.shape_cast %39 : vector<32x256xbf16> to vector<1x32x256xbf16>
    tpu.vector_store %arg6[%40, %c0_26, %c0_27], %43 {strides = array<i32>} : memref<8x32x256xbf16, #tpu.memory_space<vmem>>, vector<1x32x256xbf16>,
    %cst_28 = arith.constant 0.000000e+00 : f32
    %44 = vector.broadcast %cst_28 : f32 to vector<32x256xf32>
    %45 = arith.select %35, %44, %33 : vector<32x256xi1>, vector<32x256xf32>
    %c2_i32 = arith.constant 2 : i32
    %46 = arith.index_cast %c2_i32 : i32 to index
    %c0_29 = arith.constant 0 : index
    %c0_30 = arith.constant 0 : index
    %47 = vector.load %arg8[%46, %c0_29, %c0_30] : memref<8x32x256xf32, #tpu.memory_space<vmem>>, vector<1x32x256xf32>
    %48 = vector.shape_cast %47 : vector<1x32x256xf32> to vector<32x256xf32>
    %49 = arith.addf %45, %48 : vector<32x256xf32>
    %cst_31 = arith.constant 1.000000e+00 : f32
    %50 = vector.broadcast %cst_31 : f32 to vector<32x256xf32>
    %51 = arith.cmpf oge, %49, %50 : vector<32x256xf32>
    %cst_32 = arith.constant 1.000000e+00 : f32
    %cst_33 = arith.constant 0.000000e+00 : f32
    %52 = vector.broadcast %cst_32 : f32 to vector<32x256xf32>
    %53 = vector.broadcast %cst_33 : f32 to vector<32x256xf32>
    %54 = arith.select %51, %52, %53 : vector<32x256xi1>, vector<32x256xf32>
    %55 = arith.truncf %54 : vector<32x256xf32> to vector<32x256xbf16>
    %56 = arith.index_cast %c2_i32 : i32 to index
    %c0_34 = arith.constant 0 : index
    %c0_35 = arith.constant 0 : index
    %57 = vector.load %arg6[%56, %c0_34, %c0_35] : memref<8x32x256xbf16, #tpu.memory_space<vmem>>, vector<1x32x256xbf16>
    %58 = vector.shape_cast %57 : vector<1x32x256xbf16> to vector<32x256xbf16>
    %59 = vector.shape_cast %55 : vector<32x256xbf16> to vector<1x32x256xbf16>
    tpu.vector_store %arg6[%56, %c0_34, %c0_35], %59 {strides = array<i32>} : memref<8x32x256xbf16, #tpu.memory_space<vmem>>, vector<1x32x256xbf16>,
    %cst_36 = arith.constant 0.000000e+00 : f32
    %60 = vector.broadcast %cst_36 : f32 to vector<32x256xf32>
    %61 = arith.select %51, %60, %49 : vector<32x256xi1>, vector<32x256xf32>
    %c3_i32 = arith.constant 3 : i32
    %62 = arith.index_cast %c3_i32 : i32 to index
    %c0_37 = arith.constant 0 : index
    %c0_38 = arith.constant 0 : index
    %63 = vector.load %arg8[%62, %c0_37, %c0_38] : memref<8x32x256xf32, #tpu.memory_space<vmem>>, vector<1x32x256xf32>
    %64 = vector.shape_cast %63 : vector<1x32x256xf32> to vector<32x256xf32>
    %65 = arith.addf %61, %64 : vector<32x256xf32>
    %cst_39 = arith.constant 1.000000e+00 : f32
    %66 = vector.broadcast %cst_39 : f32 to vector<32x256xf32>
    %67 = arith.cmpf oge, %65, %66 : vector<32x256xf32>
    %cst_40 = arith.constant 1.000000e+00 : f32
    %cst_41 = arith.constant 0.000000e+00 : f32
    %68 = vector.broadcast %cst_40 : f32 to vector<32x256xf32>
    %69 = vector.broadcast %cst_41 : f32 to vector<32x256xf32>
    %70 = arith.select %67, %68, %69 : vector<32x256xi1>, vector<32x256xf32>
    %71 = arith.truncf %70 : vector<32x256xf32> to vector<32x256xbf16>
    %72 = arith.index_cast %c3_i32 : i32 to index
    %c0_42 = arith.constant 0 : index
    %c0_43 = arith.constant 0 : index
    %73 = vector.load %arg6[%72, %c0_42, %c0_43] : memref<8x32x256xbf16, #tpu.memory_space<vmem>>, vector<1x32x256xbf16>
    %74 = vector.shape_cast %73 : vector<1x32x256xbf16> to vector<32x256xbf16>
    %75 = vector.shape_cast %71 : vector<32x256xbf16> to vector<1x32x256xbf16>
    tpu.vector_store %arg6[%72, %c0_42, %c0_43], %75 {strides = array<i32>} : memref<8x32x256xbf16, #tpu.memory_space<vmem>>, vector<1x32x256xbf16>,
    %cst_44 = arith.constant 0.000000e+00 : f32
    %76 = vector.broadcast %cst_44 : f32 to vector<32x256xf32>
    %77 = arith.select %67, %76, %65 : vector<32x256xi1>, vector<32x256xf32>
    %c4_i32 = arith.constant 4 : i32
    %78 = arith.index_cast %c4_i32 : i32 to index
    %c0_45 = arith.constant 0 : index
    %c0_46 = arith.constant 0 : index
    %79 = vector.load %arg8[%78, %c0_45, %c0_46] : memref<8x32x256xf32, #tpu.memory_space<vmem>>, vector<1x32x256xf32>
    %80 = vector.shape_cast %79 : vector<1x32x256xf32> to vector<32x256xf32>
    %81 = arith.addf %77, %80 : vector<32x256xf32>
    %cst_47 = arith.constant 1.000000e+00 : f32
    %82 = vector.broadcast %cst_47 : f32 to vector<32x256xf32>
    %83 = arith.cmpf oge, %81, %82 : vector<32x256xf32>
    %cst_48 = arith.constant 1.000000e+00 : f32
    %cst_49 = arith.constant 0.000000e+00 : f32
    %84 = vector.broadcast %cst_48 : f32 to vector<32x256xf32>
    %85 = vector.broadcast %cst_49 : f32 to vector<32x256xf32>
    %86 = arith.select %83, %84, %85 : vector<32x256xi1>, vector<32x256xf32>
    %87 = arith.truncf %86 : vector<32x256xf32> to vector<32x256xbf16>
    %88 = arith.index_cast %c4_i32 : i32 to index
    %c0_50 = arith.constant 0 : index
    %c0_51 = arith.constant 0 : index
    %89 = vector.load %arg6[%88, %c0_50, %c0_51] : memref<8x32x256xbf16, #tpu.memory_space<vmem>>, vector<1x32x256xbf16>
    %90 = vector.shape_cast %89 : vector<1x32x256xbf16> to vector<32x256xbf16>
    %91 = vector.shape_cast %87 : vector<32x256xbf16> to vector<1x32x256xbf16>
    tpu.vector_store %arg6[%88, %c0_50, %c0_51], %91 {strides = array<i32>} : memref<8x32x256xbf16, #tpu.memory_space<vmem>>, vector<1x32x256xbf16>,
    %cst_52 = arith.constant 0.000000e+00 : f32
    %92 = vector.broadcast %cst_52 : f32 to vector<32x256xf32>
    %93 = arith.select %83, %92, %81 : vector<32x256xi1>, vector<32x256xf32>
    %c5_i32 = arith.constant 5 : i32
    %94 = arith.index_cast %c5_i32 : i32 to index
    %c0_53 = arith.constant 0 : index
    %c0_54 = arith.constant 0 : index
    %95 = vector.load %arg8[%94, %c0_53, %c0_54] : memref<8x32x256xf32, #tpu.memory_space<vmem>>, vector<1x32x256xf32>
    %96 = vector.shape_cast %95 : vector<1x32x256xf32> to vector<32x256xf32>
    %97 = arith.addf %93, %96 : vector<32x256xf32>
    %cst_55 = arith.constant 1.000000e+00 : f32
    %98 = vector.broadcast %cst_55 : f32 to vector<32x256xf32>
    %99 = arith.cmpf oge, %97, %98 : vector<32x256xf32>
    %cst_56 = arith.constant 1.000000e+00 : f32
    %cst_57 = arith.constant 0.000000e+00 : f32
    %100 = vector.broadcast %cst_56 : f32 to vector<32x256xf32>
    %101 = vector.broadcast %cst_57 : f32 to vector<32x256xf32>
    %102 = arith.select %99, %100, %101 : vector<32x256xi1>, vector<32x256xf32>
    %103 = arith.truncf %102 : vector<32x256xf32> to vector<32x256xbf16>
    %104 = arith.index_cast %c5_i32 : i32 to index
    %c0_58 = arith.constant 0 : index
    %c0_59 = arith.constant 0 : index
    %105 = vector.load %arg6[%104, %c0_58, %c0_59] : memref<8x32x256xbf16, #tpu.memory_space<vmem>>, vector<1x32x256xbf16>
    %106 = vector.shape_cast %105 : vector<1x32x256xbf16> to vector<32x256xbf16>
    %107 = vector.shape_cast %103 : vector<32x256xbf16> to vector<1x32x256xbf16>
    tpu.vector_store %arg6[%104, %c0_58, %c0_59], %107 {strides = array<i32>} : memref<8x32x256xbf16, #tpu.memory_space<vmem>>, vector<1x32x256xbf16>,
    %cst_60 = arith.constant 0.000000e+00 : f32
    %108 = vector.broadcast %cst_60 : f32 to vector<32x256xf32>
    %109 = arith.select %99, %108, %97 : vector<32x256xi1>, vector<32x256xf32>
    %c6_i32 = arith.constant 6 : i32
    %110 = arith.index_cast %c6_i32 : i32 to index
    %c0_61 = arith.constant 0 : index
    %c0_62 = arith.constant 0 : index
    %111 = vector.load %arg8[%110, %c0_61, %c0_62] : memref<8x32x256xf32, #tpu.memory_space<vmem>>, vector<1x32x256xf32>
    %112 = vector.shape_cast %111 : vector<1x32x256xf32> to vector<32x256xf32>
    %113 = arith.addf %109, %112 : vector<32x256xf32>
    %cst_63 = arith.constant 1.000000e+00 : f32
    %114 = vector.broadcast %cst_63 : f32 to vector<32x256xf32>
    %115 = arith.cmpf oge, %113, %114 : vector<32x256xf32>
    %cst_64 = arith.constant 1.000000e+00 : f32
    %cst_65 = arith.constant 0.000000e+00 : f32
    %116 = vector.broadcast %cst_64 : f32 to vector<32x256xf32>
    %117 = vector.broadcast %cst_65 : f32 to vector<32x256xf32>
    %118 = arith.select %115, %116, %117 : vector<32x256xi1>, vector<32x256xf32>
    %119 = arith.truncf %118 : vector<32x256xf32> to vector<32x256xbf16>
    %120 = arith.index_cast %c6_i32 : i32 to index
    %c0_66 = arith.constant 0 : index
    %c0_67 = arith.constant 0 : index
    %121 = vector.load %arg6[%120, %c0_66, %c0_67] : memref<8x32x256xbf16, #tpu.memory_space<vmem>>, vector<1x32x256xbf16>
    %122 = vector.shape_cast %121 : vector<1x32x256xbf16> to vector<32x256xbf16>
    %123 = vector.shape_cast %119 : vector<32x256xbf16> to vector<1x32x256xbf16>
    tpu.vector_store %arg6[%120, %c0_66, %c0_67], %123 {strides = array<i32>} : memref<8x32x256xbf16, #tpu.memory_space<vmem>>, vector<1x32x256xbf16>,
    %cst_68 = arith.constant 0.000000e+00 : f32
    %124 = vector.broadcast %cst_68 : f32 to vector<32x256xf32>
    %125 = arith.select %115, %124, %113 : vector<32x256xi1>, vector<32x256xf32>
    %c7_i32 = arith.constant 7 : i32
    %126 = arith.index_cast %c7_i32 : i32 to index
    %c0_69 = arith.constant 0 : index
    %c0_70 = arith.constant 0 : index
    %127 = vector.load %arg8[%126, %c0_69, %c0_70] : memref<8x32x256xf32, #tpu.memory_space<vmem>>, vector<1x32x256xf32>
    %128 = vector.shape_cast %127 : vector<1x32x256xf32> to vector<32x256xf32>
    %129 = arith.addf %125, %128 : vector<32x256xf32>
    %cst_71 = arith.constant 1.000000e+00 : f32
    %130 = vector.broadcast %cst_71 : f32 to vector<32x256xf32>
    %131 = arith.cmpf oge, %129, %130 : vector<32x256xf32>
    %cst_72 = arith.constant 1.000000e+00 : f32
    %cst_73 = arith.constant 0.000000e+00 : f32
    %132 = vector.broadcast %cst_72 : f32 to vector<32x256xf32>
    %133 = vector.broadcast %cst_73 : f32 to vector<32x256xf32>
    %134 = arith.select %131, %132, %133 : vector<32x256xi1>, vector<32x256xf32>
    %135 = arith.truncf %134 : vector<32x256xf32> to vector<32x256xbf16>
    %136 = arith.index_cast %c7_i32 : i32 to index
    %c0_74 = arith.constant 0 : index
    %c0_75 = arith.constant 0 : index
    %137 = vector.load %arg6[%136, %c0_74, %c0_75] : memref<8x32x256xbf16, #tpu.memory_space<vmem>>, vector<1x32x256xbf16>
    %138 = vector.shape_cast %137 : vector<1x32x256xbf16> to vector<32x256xbf16>
    %139 = vector.shape_cast %135 : vector<32x256xbf16> to vector<1x32x256xbf16>
    tpu.vector_store %arg6[%136, %c0_74, %c0_75], %139 {strides = array<i32>} : memref<8x32x256xbf16, #tpu.memory_space<vmem>>, vector<1x32x256xbf16>,
    %cst_76 = arith.constant 0.000000e+00 : f32
    %140 = vector.broadcast %cst_76 : f32 to vector<32x256xf32>
    %141 = arith.select %131, %140, %129 : vector<32x256xi1>, vector<32x256xf32>
    %c8_i32 = arith.constant 8 : i32
    %c0_77 = arith.constant 0 : index
    %c0_78 = arith.constant 0 : index
    %142 = vector.load %arg7[%c0_77, %c0_78] : memref<32x256xf32, #tpu.memory_space<vmem>>, vector<32x256xf32>
    tpu.vector_store %arg7[%c0_77, %c0_78], %141 {strides = array<i32>} : memref<32x256xf32, #tpu.memory_space<vmem>>, vector<32x256xf32>,
    return
  }
  func.func @transform_0(%arg0: i32, %arg1: i32, %arg2: i32) -> (i32, i32, i32) {
    %c0_i32 = arith.constant 0 : i32
    %c0_i32_0 = arith.constant 0 : i32
    return %arg2, %arg0, %c0_i32 : i32, i32, i32
  }
  func.func @transform_1(%arg0: i32, %arg1: i32, %arg2: i32) -> (i32, i32) {
    %c0_i32 = arith.constant 0 : i32
    %c0_i32_0 = arith.constant 0 : i32
    return %c0_i32, %arg1 : i32, i32
  }
  func.func @transform_2(%arg0: i32, %arg1: i32, %arg2: i32) -> (i32, i32) {
    %c0_i32 = arith.constant 0 : i32
    %c0_i32_0 = arith.constant 0 : i32
    return %c0_i32, %arg1 : i32, i32
  }
  func.func @transform_3(%arg0: i32, %arg1: i32, %arg2: i32) -> (i32, i32, i32) {
    %c0_i32 = arith.constant 0 : i32
    return %arg2, %arg0, %arg1 : i32, i32, i32
  }
}

</mosaic_0001>

<bundles_post_ra>
// kernel: tpu_custom_call.1
= control target key start
LH: loop header
LB: loop body
LE: loop exit
PB: predicated region body
PF: predicated region fallthrough
CT: control target
= control target key end

     0   :  { %s2518_s0 = inlined_call_operand.hbm [shape: f32[8,64,128], index: 0, kind: input, shape index: {}]   ;;  %s2519_s1 = inlined_call_operand.hbm [shape: bf16[128,256], index: 1, kind: input, shape index: {}]   ;;  %s2520_s2 = inlined_call_operand.vmem [shape: f32[1,256], index: 2, kind: input, shape index: {}]   ;;  %s2521_s3 = inlined_call_operand.hbm [shape: bf16[8,64,256], index: 3, kind: output, shape index: {}]  }
   0x1   :  { %2528 = sst [smem:[#allocation18_spill]] %s2519_s1 }
   0x2   :  { %8 = vsyncpa [#allocation5], 0 }
   0x3   :  { %10 = vsyncpa [#allocation5 + $0x1], 0 }
   0x4   :  { %11 = vsyncpa [#allocation8], 0 }
   0x5   :  { %12 = vsyncpa [#allocation6], 0 }
   0x6   :  { %14 = vsyncpa [#allocation6 + $0x1], 0  ;;  %s1851_s12 = smov 0   ;;  %s1853_s13 = smov 0  }
   0x7   :  { %s1855_s14 = smov 0   ;;  %s1857_s15 = smov 0  }
   0x8   :  { %s1859_s16 = smov 0   ;;  %s1861_s17 = smov 0  }
   0x9 LB: > { %s1455_s18 = sadd.s32 4294967295, %s1811_s17   ;;  %s1456_s19 = sadd.s32 4294967294, %s1811_s17   ;;  %s1811_s17 = sphi %s1861_s17, %s20_s17   ;;  %s1807_s16 = sphi %s1859_s16, %s2547_s16   ;;  %s1803_s15 = sphi %s1857_s15, %s2546_s15   ;;  %s1799_s14 = sphi %s1855_s14, %s2545_s14   ;;  %s1795_s13 = sphi %s1853_s13, %s2544_s13   ;;  %s1791_s12 = sphi %s1851_s12, %s2543_s12  }
   0xa   : > { %s39_s20 = sadd.s32 1, %s1807_s16  ;;  %s48_s21 = sadd.s32 1, %s1799_s14 }
   0xb   : > { %p41_p0 = scmp.ge.s32.totalorder %s39_s20, 2  ;;  %p55_p1 = scmp.ne.s32.totalorder %s1799_s14, %s1795_s13 }
   0xc   : > { %p56_p2 = scmp.eq.s32.totalorder %s1811_s17, 0  ;;  %p61_p3 = scmp.ne.s32.totalorder %s1795_s13, %s1791_s12 }
   0xd   : > { %s2549_s20 = smov (%p41_p0, %s39_s20), 0  ;;  %p1896_p5 = scmp.eq.s32.totalorder %s1455_s18, 0 }
   0xe   : > { %p1892_p4 = por %p56_p2, %p55_p1  ;;  %s44_s24 = ssub.s32 %s1807_s16, %s2549_s20 }
   0xf   : > { %s2530_s23 = scalar_select %p1896_p5, 1, 0 }
  0x10   : > { %s2529_s22 = scalar_select %p1892_p4, 1, 0 }
  0x11   : > { %p141_p6 = scmp.eq.s32.totalorder %s1455_s18, 1  ;;  %p46_p7 = scmp.eq.s32.totalorder %s44_s24, 0 }
  0x12   : > { %p1904_p8 = por %p1896_p5, %p61_p3  ;;  %p147_p10 = scmp.eq.s32.totalorder %s1456_s19, 1 }
  0x13   : > { %p1908_p9 = por %p141_p6, %p55_p1  ;;  %p1457_p12 = scmp.ge.s32.totalorder %s1811_s17, 1 }
  0x14   : > { %s2531_s25 = scalar_select %p1904_p8, 1, 0 }
  0x15   : > { %s2532_s26 = scalar_select %p1908_p9, 1, 0 }
  0x16   : > { %s1913_s27 = scalar_select %p46_p7, %s1799_s14, %s48_s21  }
  0x17   : > { %p1915_p11 = por %p147_p10, %p61_p3  ;;  %p154_p13 = scmp.lt.s32.totalorder %s1811_s17, 3 }
  0x18   : > { %s1813_s30 = smov [#allocation7]   ;;  %s2536_s1 = sld [smem:[#allocation18_spill]] }
  0x19   : > { %s2533_s28 = scalar_select %p1915_p11, 1, 0 }
  0x1a   : > { %p1921_p0 = pnand %p1457_p12, %p154_p13  ;;  %s169_s4 = sshll.u32 %s1813_s30, 4  ;;  %s170_s4 = int_to_ptr.vmem [resolvable:$true] %s169_s4 }
  0x1c   : > { %s2534_s29 = scalar_select %p1921_p0, 1, 0 }
  0x1d   : > { %p1624_p1 = pneg %p1921_p0 }
  0x1e   : > { %s1725_s8 = scalar_lea.hbm %s2536_s1, 2048 }
  0x1f   : > { %p1929_p2 = pnand %p1624_p1, %p1896_p5  ;;  %p1726_p3 = scmp.ne.s32.totalorder %s2536_s1, %s1725_s8 }
  0x20   : > { %p1732_p12 = scmp.lt.u32.totalorder %s1725_s8, %s2536_s1 }
  0x21   : > { %p1727_p6 = pneg %p1929_p2 }
  0x23   : > { %p1728_p7 = pnand %p1727_p6, %p1726_p3 }
  0x25   : > { %p1729_p10 = pneg %p1728_p7 }
  0x27   : > { %p1734_p13 = pnand %p1732_p12, %p1729_p10 }
  0x29   : > { %1737 = shalt.err (!%p1734_p13)
}
  0x2a   : > { %s1738_s19 = scalar_lea.vmem %s170_s4, 2048  ;;  %p1746_p5 = scmp.lt.s32.totalorder %s170_s4, %s170_s4 }
  0x2b   : > { %p1739_p1 = scmp.ne.s32.totalorder %s170_s4, %s1738_s19  ;;  %p1747_p8 = scmp.lt.s32.totalorder %s1738_s19, %s1738_s19 }
  0x2d   : > { %p1741_p11 = pnand %p1739_p1, %p1727_p6  ;;  %p1748_p0 = por %p1747_p8, %p1746_p5 }
  0x2f   : > { %p1742_p9 = pneg %p1741_p11 }
  0x31   : > { %p1749_p4 = pnand %p1748_p0, %p1742_p9 }
  0x33   : > { %1752 = shalt.err (!%p1749_p4)
}
  0x34   : > { %s1814_s21 = smov 128   ;;  %s1815_s24 = smov 8  }
  0x35   : > { %1627 = dma.hbm_to_vmem [thread:$0]  (!%p1929_p2), %s2536_s1, 2048, %s170_s4, [#allocation8], %s1814_s21, %s1814_s21, %s1815_s24  }
  0x36   : > { %p1460_p3 = scmp.ge.s32.totalorder %s1811_s17, 2 }
  0x38   : > { %187 = sbr.rel (%p1460_p3) target bundleno = 78 (0x4e), region = 24 }
  0x3f   : > { %s191_s7 = sand.u32 1, %s1799_s14   ;;  %s1552_s8 = sshll.u32 %s1807_s16, 9 }
  0x40   : > { %s1461_s5 = sshll.u32 %s191_s7, 8  ;;  %s204_s4 = scalar_lea.hbm %s2518_s0, %s1552_s8 }
  0x41   : > { %p2537_p4 = scmp.ne.s32.totalorder %s2529_s22, 0  ;;  %s195_s18 = scalar_lea.vmem [#allocation4], %s1461_s5 }
  0x42   : > { %s217_s19 = sshll.u32 %s195_s18, 4  ;;  %s1816_s24 = smov 1024   ;;  %s218_s19 = int_to_ptr.vmem [resolvable:$true] %s217_s19 }
  0x43   : > { %s1605_s11 = scalar_select %p2537_p4, [#allocation0], [#allocation14] }
  0x44   : > { %1606 = sst [smem:[#allocation11]] (%p2537_p4), %s1816_s24  ;;  %s1817_s30 = smov 512  }
  0x45   : > { %s209_s21 = sld [smem:[%s1605_s11]]   ;;  %s1818_s6 = smov 4  }
  0x46   : > { %1607 = sst [smem:[#allocation11 + $0x1]] (%p2537_p4), %s1817_s30  ;;  %s1819_s1 = smov 128  }
  0x47   : > { %1608 = sst [smem:[#allocation11 + $0x2]] (%p2537_p4), %s1818_s6  ;;  %s1820_s5 = smov 8  }
  0x48   : > { %1609 = sst [smem:[#allocation11 + $0x3]] (%p2537_p4), %s1819_s1  ;;  %s192_s10 = scalar_lea.sflag [#allocation5], %s191_s7 }
  0x49   : > { %1610 = sst [smem:[#allocation11 + $0x4]] (%p2537_p4), %s1819_s1  ;;  %s1821_s11 = smov [#allocation10]  }
  0x4a   : > { %1611 = sst [smem:[#allocation11 + $0x5]] (%p2537_p4), %s1820_s5 }
  0x4b   : > { %s1464_s8 = sshll.u32 %s209_s21, 26 }
  0x4c   : > { %s1465_s9 = sadd.s32 134217728, %s1464_s8 }
  0x4d   : > { %1612 = dma.general (%p2537_p4), %s204_s4, 4096, %s218_s19, %s192_s10, %s1821_s11, [#allocation11], %s1465_s9, 0  }
  0x4e PF: > { %p2538_p5 = scmp.ne.s32.totalorder %s2534_s29, 0 }
  0x4f   : > { %s1976_s18 = sand.u32 (!%p2538_p5), 1, %s1795_s13   ;;  %p2539_p8 = scmp.ne.s32.totalorder (!%p2538_p5), %s2531_s25, 0 }
  0x50   : > { %242 = sbr.rel (%p2538_p5) target bundleno = 453 (0x1c5), region = 32  ;;  %s1467_s1 = sshll.u32 (!%p2538_p5), %s1976_s18, 8 }
  0x51   : > { %s245_s21 = scalar_lea.sflag (!%p2538_p5), [#allocation5], %s1976_s18  ;;  %s1982_s24 = scalar_lea.vmem (!%p2538_p5), [#allocation4], %s1467_s1 }
  0x57   : > { %1778 = dma.done.wait (%p2539_p8), %s245_s21, 4096  }
  0x58   : > { %1780 = vsyncadd (%p2539_p8), %s245_s21, 4294963200  ;;  %p2540_p9 = scmp.ne.s32.totalorder %s2530_s23, 0 }
  0x5a   : > { %1782 = dma.done.wait (%p2540_p9), [#allocation8], 2048  }
  0x5b   : > { %1784 = vsyncadd (%p2540_p9), [#allocation8], 4294965248  ;;  %v1822_v0 = vmov 0   ;;  %v1701_v1 = vld [vmem:[#allocation7 + $0x4] ss:$8 sps:$4 sm:$0xff]   ;;  %v305_v23 = vld [vmem:[%s1982_s24 + $0x10] sm:$0xff] }
  0x5c   : > { %491 = vmatprep.mubr.bf16.mxu0 %v1822_v0  ;;  %571 = vmatprep.mubr.bf16.mxu1 %v1822_v0  ;;  %v1703_v2 = vld [vmem:[#allocation7] ss:$8 sps:$4 sm:$0xff]   ;;  %v1704_v3 = vld [vmem:[#allocation7 + $0x14] ss:$8 sps:$4 sm:$0xff]   ;;  %v1706_v4 = vld [vmem:[#allocation7 + $0x10] ss:$8 sps:$4 sm:$0xff]  }
  0x5d   : > { %459 = vmatprep.subr.bf16.mxu0 %v1701_v1  ;;  %1587 = vmatprep.subr.bf16.mxu1 %v1701_v1  ;;  %v1707_v5 = vld [vmem:[#allocation7 + $0x24] ss:$8 sps:$4 sm:$0xff]   ;;  %v1709_v6 = vld [vmem:[#allocation7 + $0x20] ss:$8 sps:$4 sm:$0xff]   ;;  %v1710_v7 = vld [vmem:[#allocation7 + $0x34] ss:$8 sps:$4 sm:$0xff]  }
  0x5e   : > { %460 = vmatpush1.bf16.msra.mxu0 %v1703_v2  ;;  %1595 = vmatpush1.bf16.msra.mxu1 %v1703_v2  ;;  %v1712_v8 = vld [vmem:[#allocation7 + $0x30] ss:$8 sps:$4 sm:$0xff]   ;;  %v1713_v9 = vld [vmem:[#allocation7 + $0x44] ss:$8 sps:$4 sm:$0xff]   ;;  %v1715_v10 = vld [vmem:[#allocation7 + $0x40] ss:$8 sps:$4 sm:$0xff]   ;;  %v369_v2 = vlaneseq }
  0x5f   : > { %461 = vmatprep.subr.bf16.mxu0 %v1704_v3  ;;  %1588 = vmatprep.subr.bf16.mxu1 %v1704_v3  ;;  %v1716_v11 = vld [vmem:[#allocation7 + $0x54] ss:$8 sps:$4 sm:$0xff]   ;;  %v1718_v12 = vld [vmem:[#allocation7 + $0x50] ss:$8 sps:$4 sm:$0xff]   ;;  %v1719_v13 = vld [vmem:[#allocation7 + $0x64] ss:$8 sps:$4 sm:$0xff]  }
  0x60   : > { %v1721_v14 = vld [vmem:[#allocation7 + $0x60] ss:$8 sps:$4 sm:$0xff]   ;;  %v1722_v15 = vld [vmem:[#allocation7 + $0x74] ss:$8 sps:$4 sm:$0xff]   ;;  %v1724_v16 = vld [vmem:[#allocation7 + $0x70] ss:$8 sps:$4 sm:$0xff]  }
  0x61   : > { %v303_v17 = vld [vmem:[%s1982_s24] sm:$0xff]  ;;  %v304_v18 = vld [vmem:[%s1982_s24 + $0x8] sm:$0xff]  ;;  %v306_v24 = vld [vmem:[%s1982_s24 + $0x18] sm:$0xff]  ;;  %v370_v3 = vshrl.u32 %v369_v2, 7  ;;  %s2069_s25 = scalar_lea.vmem [#allocation9], %s1467_s1  ;;  %s1291_s29 = scalar_lea.sflag [#allocation6], %s1976_s18 }
  0x62   : > { %462 = vmatpush1.bf16.msra.mxu0 %v1706_v4  ;;  %1596 = vmatpush1.bf16.msra.mxu1 %v1706_v4  ;;  %v319_v19 = vld [vmem:[%s1982_s24 + $0x80] sm:$0xff]  ;;  %v320_v20 = vld [vmem:[%s1982_s24 + $0x88] sm:$0xff]  ;;  %v335_v21 = vpack.c.bf16 %v304_v18, %v303_v17  ;;  %v321_v25 = vld [vmem:[%s1982_s24 + $0x90] sm:$0xff]  ;;  %v336_v27 = vpack.c.bf16 %v306_v24, %v305_v23 }
  0x63   : > { %463 = vmatprep.subr.bf16.mxu0 %v1707_v5  ;;  %1589 = vmatprep.subr.bf16.mxu1 %v1707_v5  ;;  %v343_v22 = vpack.c.bf16 %v320_v20, %v319_v19  ;;  %v322_v26 = vld [vmem:[%s1982_s24 + $0x98] sm:$0xff]  ;;  %v307_v29 = vld [vmem:[%s1982_s24 + $0x20] sm:$0xff]  ;;  %v308_v30 = vld [vmem:[%s1982_s24 + $0x28] sm:$0xff]  ;;  %v371_v4 = vsub.s32 0, %v370_v3  ;;  %v1823_v19 = vmov 0.0  }
  0x64   : > { %v344_v28 = vpack.c.bf16 %v322_v26, %v321_v25  ;;  %v323_v31 = vld [vmem:[%s1982_s24 + $0xa0] sm:$0xff]  ;;  %v324_v32 = vld [vmem:[%s1982_s24 + $0xa8] sm:$0xff]  ;;  %v337_v33 = vpack.c.bf16 %v308_v30, %v307_v29  ;;  %v309_v35 = vld [vmem:[%s1982_s24 + $0x30] sm:$0xff] }
  0x65   : > { %v345_v34 = vpack.c.bf16 %v324_v32, %v323_v31  ;;  %v310_v36 = vld [vmem:[%s1982_s24 + $0x38] sm:$0xff]  ;;  %v325_v37 = vld [vmem:[%s1982_s24 + $0xb0] sm:$0xff]  ;;  %v311_v41 = vld [vmem:[%s1982_s24 + $0x40] sm:$0xff] }
  0x66   : > { %464 = vmatpush1.bf16.msra.mxu0 %v1709_v6  ;;  %1597 = vmatpush1.bf16.msra.mxu1 %v1709_v6  ;;  %v326_v38 = vld [vmem:[%s1982_s24 + $0xb8] sm:$0xff]  ;;  %v338_v39 = vpack.c.bf16 %v310_v36, %v309_v35  ;;  %v312_v42 = vld [vmem:[%s1982_s24 + $0x48] sm:$0xff]  ;;  %v327_v43 = vld [vmem:[%s1982_s24 + $0xc0] sm:$0xff]  ;;  %v375_v6 = vsub.s32 1, %v370_v3 }
  0x67   : > { %465 = vmatprep.subr.bf16.mxu0 %v1710_v7  ;;  %1590 = vmatprep.subr.bf16.mxu1 %v1710_v7  ;;  %v346_v40 = vpack.c.bf16 %v326_v38, %v325_v37  ;;  %v328_v44 = vld [vmem:[%s1982_s24 + $0xc8] sm:$0xff]  ;;  %v339_v45 = vpack.c.bf16 %v312_v42, %v311_v41  ;;  %v313_v47 = vld [vmem:[%s1982_s24 + $0x50] sm:$0xff]  ;;  %v314_v48 = vld [vmem:[%s1982_s24 + $0x58] sm:$0xff] }
  0x68   : > { %v347_v46 = vpack.c.bf16 %v328_v44, %v327_v43  ;;  %v329_v49 = vld [vmem:[%s1982_s24 + $0xd0] sm:$0xff]  ;;  %v330_v50 = vld [vmem:[%s1982_s24 + $0xd8] sm:$0xff]  ;;  %v340_v51 = vpack.c.bf16 %v314_v48, %v313_v47  ;;  %v315_v53 = vld [vmem:[%s1982_s24 + $0x60] sm:$0xff] }
  0x69   : > { %v348_v52 = vpack.c.bf16 %v330_v50, %v329_v49  ;;  %v316_v54 = vld [vmem:[%s1982_s24 + $0x68] sm:$0xff]  ;;  %v331_v55 = vld [vmem:[%s1982_s24 + $0xe0] sm:$0xff]  ;;  %v317_v59 = vld [vmem:[%s1982_s24 + $0x70] sm:$0xff] }
  0x6a   : > { %466 = vmatpush1.bf16.msra.mxu0 %v1712_v8  ;;  %1598 = vmatpush1.bf16.msra.mxu1 %v1712_v8  ;;  %v332_v56 = vld [vmem:[%s1982_s24 + $0xe8] sm:$0xff]  ;;  %v341_v57 = vpack.c.bf16 %v316_v54, %v315_v53  ;;  %v318_v60 = vld [vmem:[%s1982_s24 + $0x78] sm:$0xff]  ;;  %v333_v61 = vld [vmem:[%s1982_s24 + $0xf0] sm:$0xff] }
  0x6b   : > { %467 = vmatprep.subr.bf16.mxu0 %v1713_v9  ;;  %1591 = vmatprep.subr.bf16.mxu1 %v1713_v9  ;;  %v349_v58 = vpack.c.bf16 %v332_v56, %v331_v55  ;;  %v334_v62 = vld [vmem:[%s1982_s24 + $0xf8] sm:$0xff]  ;;  %v342_v63 = vpack.c.bf16 %v318_v60, %v317_v59  ;;  %v367_v5 = vld [vmem:[%s2520_s2] sm:$0x3] }
  0x6c   : > { %v350_v1 = vpack.c.bf16 %v334_v62, %v333_v61  ;;  %v2043_v7 = vrot.slane %v367_v5, %v371_v4  ;;  %v2045_v8 = vrot.slane %v367_v5, %v375_v6 }
  0x6e   : > { %468 = vmatpush1.bf16.msra.mxu0 %v1715_v10  ;;  %1599 = vmatpush1.bf16.msra.mxu1 %v1715_v10 }
  0x6f   : > { %469 = vmatprep.subr.bf16.mxu0 %v1716_v11  ;;  %1592 = vmatprep.subr.bf16.mxu1 %v1716_v11 }
  0x72   : > { %470 = vmatpush1.bf16.msra.mxu0 %v1718_v12  ;;  %1600 = vmatpush1.bf16.msra.mxu1 %v1718_v12 }
  0x73   : > { %471 = vmatprep.subr.bf16.mxu0 %v1719_v13  ;;  %1593 = vmatprep.subr.bf16.mxu1 %v1719_v13 }
  0x76   : > { %472 = vmatpush1.bf16.msra.mxu0 %v1721_v14  ;;  %1601 = vmatpush1.bf16.msra.mxu1 %v1721_v14 }
  0x77   : > { %473 = vmatprep.subr.bf16.mxu0 %v1722_v15  ;;  %1594 = vmatprep.subr.bf16.mxu1 %v1722_v15 }
  0x7a   : > { %474 = vmatpush1.bf16.msra.mxu0 %v1724_v16  ;;  %1602 = vmatpush1.bf16.msra.mxu1 %v1724_v16 }
  0x7d   : > { %492 = vmatmul.mubr.bf16.vlgmr.msra.gmra.mrb[0].mxu0 %v335_v21  ;;  %572 = vmatmul.mubr.bf16.vlgmr.msra.gmra.mrb[0].mxu1 %v343_v22 }
  0x7e   : > { %501 = vmatprep.mubr.bf16.mxu0 %v1822_v0  ;;  %581 = vmatprep.mubr.bf16.mxu1 %v1822_v0 }
  0x85   : > { %502 = vmatmul.mubr.bf16.gmra.mrb[4].mxu0 %v336_v27  ;;  %582 = vmatmul.mubr.bf16.gmra.mrb[4].mxu1 %v344_v28 }
  0x86   : > { %511 = vmatprep.mubr.bf16.mxu0 %v1822_v0  ;;  %591 = vmatprep.mubr.bf16.mxu1 %v1822_v0 }
  0x8d   : > { %512 = vmatmul.mubr.bf16.gmra.mrb[8].mxu0 %v337_v33  ;;  %592 = vmatmul.mubr.bf16.gmra.mrb[8].mxu1 %v345_v34 }
  0x8e   : > { %521 = vmatprep.mubr.bf16.mxu0 %v1822_v0  ;;  %601 = vmatprep.mubr.bf16.mxu1 %v1822_v0 }
  0x95   : > { %522 = vmatmul.mubr.bf16.gmra.mrb[12].mxu0 %v338_v39  ;;  %602 = vmatmul.mubr.bf16.gmra.mrb[12].mxu1 %v346_v40 }
  0x96   : > { %531 = vmatprep.mubr.bf16.mxu0 %v1822_v0  ;;  %611 = vmatprep.mubr.bf16.mxu1 %v1822_v0 }
  0x9d   : > { %532 = vmatmul.mubr.bf16.gmra.mrb[16].mxu0 %v339_v45  ;;  %612 = vmatmul.mubr.bf16.gmra.mrb[16].mxu1 %v347_v46 }
  0x9e   : > { %541 = vmatprep.mubr.bf16.mxu0 %v1822_v0  ;;  %621 = vmatprep.mubr.bf16.mxu1 %v1822_v0 }
  0xa5   : > { %542 = vmatmul.mubr.bf16.gmra.mrb[20].mxu0 %v340_v51  ;;  %622 = vmatmul.mubr.bf16.gmra.mrb[20].mxu1 %v348_v52 }
  0xa6   : > { %551 = vmatprep.mubr.bf16.mxu0 %v1822_v0  ;;  %631 = vmatprep.mubr.bf16.mxu1 %v1822_v0 }
  0xad   : > { %552 = vmatmul.mubr.bf16.gmra.mrb[24].mxu0 %v341_v57  ;;  %632 = vmatmul.mubr.bf16.gmra.mrb[24].mxu1 %v349_v58 }
  0xae   : > { %561 = vmatprep.mubr.bf16.mxu0 %v1822_v0  ;;  %641 = vmatprep.mubr.bf16.mxu1 %v1822_v0 }
  0xb5   : > { %562 = vmatmul.mubr.bf16.gmra.mrb[28].mxu0 %v342_v63  ;;  %642 = vmatmul.mubr.bf16.gmra.mrb[28].mxu1 %v350_v1 }
 0x150   : > { %v493_v9 = vpop.f32.mrb[0].mxu0  ;;  %v2047_v0 = vpop.f32.mrb[0].mxu1 }
 0x151   : > { %v494_v10 = vadd.f32 %v493_v9, %v2043_v7  ;;  %v495_v11 = vpop.f32.mrb[1].mxu0  ;;  %v2050_v12 = vpop.f32.mrb[1].mxu1 }
 0x152   : > { %v496_v13 = vadd.f32 %v495_v11, %v2045_v8  ;;  %v497_v14 = vpop.f32.mrb[2].mxu0  ;;  %v2053_v15 = vpop.f32.mrb[2].mxu1 }
 0x153   : > { %vm740_vm0 = vcmp.ge.f32.partialorder %v494_v10, 1.0  ;;  %v498_v16 = vadd.f32 %v497_v14, %v2043_v7  ;;  %v499_v17 = vpop.f32.mrb[3].mxu0  ;;  %v2056_v18 = vpop.f32.mrb[3].mxu1 }
 0x154   : > { %v748_v20 = vsel %vm740_vm0, 1.0, %v1823_v19  ;;  %vm741_vm1 = vcmp.ge.f32.partialorder %v496_v13, 1.0  ;;  %v500_v21 = vadd.f32 %v499_v17, %v2045_v8  ;;  %v784_v50 = vsel %vm740_vm0, 0.0, %v494_v10 }
 0x155   : > { %v749_v22 = vsel %vm741_vm1, 1.0, %v1823_v19  ;;  %vm742_vm2 = vcmp.ge.f32.partialorder %v498_v16, 1.0  ;;  %v785_v54 = vsel %vm741_vm1, 0.0, %v496_v13 }
 0x156   : > { %v1553_v23 = vpack.c.bf16 %v749_v22, %v748_v20  ;;  %v750_v24 = vsel %vm742_vm2, 1.0, %v1823_v19  ;;  %vm743_vm3 = vcmp.ge.f32.partialorder %v500_v21, 1.0  ;;  %v786_v59 = vsel %vm742_vm2, 0.0, %v498_v16 }
 0x157   : > { %v751_v25 = vsel %vm743_vm3, 1.0, %v1823_v19  ;;  %v787_v62 = vsel %vm743_vm3, 0.0, %v500_v21 }
 0x158   : > { %780 = vst [vmem:[%s2069_s25] sm:$0xff] %v1553_v23  ;;  %v1554_v26 = vpack.c.bf16 %v751_v25, %v750_v24  ;;  %v503_v27 = vpop.f32.mrb[4].mxu0  ;;  %v2072_v28 = vpop.f32.mrb[4].mxu1 }
 0x159   : > { %v504_v29 = vadd.f32 %v503_v27, %v2043_v7  ;;  %v505_v30 = vpop.f32.mrb[5].mxu0  ;;  %v2075_v31 = vpop.f32.mrb[5].mxu1 }
 0x15a   : > { %781 = vst [vmem:[%s2069_s25 + $0x8] sm:$0xff] %v1554_v26  ;;  %v506_v32 = vadd.f32 %v505_v30, %v2045_v8  ;;  %v507_v33 = vpop.f32.mrb[6].mxu0  ;;  %v2079_v34 = vpop.f32.mrb[6].mxu1 }
 0x15b   : > { %vm744_vm4 = vcmp.ge.f32.partialorder %v504_v29, 1.0  ;;  %v508_v35 = vadd.f32 %v507_v33, %v2043_v7  ;;  %v509_v36 = vpop.f32.mrb[7].mxu0  ;;  %v2082_v37 = vpop.f32.mrb[7].mxu1 }
 0x15c   : > { %v752_v38 = vsel %vm744_vm4, 1.0, %v1823_v19  ;;  %vm745_vm5 = vcmp.ge.f32.partialorder %v506_v32, 1.0  ;;  %v510_v39 = vadd.f32 %v509_v36, %v2045_v8  ;;  %v788_v16 = vsel %vm744_vm4, 0.0, %v504_v29 }
 0x15d   : > { %v753_v40 = vsel %vm745_vm5, 1.0, %v1823_v19  ;;  %vm746_vm6 = vcmp.ge.f32.partialorder %v508_v35, 1.0  ;;  %v789_v23 = vsel %vm745_vm5, 0.0, %v506_v32 }
 0x15e   : > { %v1555_v41 = vpack.c.bf16 %v753_v40, %v752_v38  ;;  %v754_v42 = vsel %vm746_vm6, 1.0, %v1823_v19  ;;  %vm747_vm7 = vcmp.ge.f32.partialorder %v510_v39, 1.0  ;;  %v790_v30 = vsel %vm746_vm6, 0.0, %v508_v35 }
 0x15f   : > { %v755_v43 = vsel %vm747_vm7, 1.0, %v1823_v19  ;;  %v791_v36 = vsel %vm747_vm7, 0.0, %v510_v39  ;;  %v2164_v35 = vadd.f32 %v2047_v0, %v2043_v7 }
 0x160   : > { %782 = vst [vmem:[%s2069_s25 + $0x10] sm:$0xff] %v1555_v41  ;;  %v1556_v44 = vpack.c.bf16 %v755_v43, %v754_v42  ;;  %v513_v45 = vpop.f32.mrb[8].mxu0  ;;  %v2094_v46 = vpop.f32.mrb[8].mxu1  ;;  %v2168_v41 = vadd.f32 %v2050_v12, %v2045_v8  ;;  %v2176_v42 = vadd.f32 %v2053_v15, %v2043_v7 }
 0x161   : > { %v514_v47 = vadd.f32 %v513_v45, %v2043_v7  ;;  %v515_v48 = vpop.f32.mrb[9].mxu0  ;;  %v2097_v49 = vpop.f32.mrb[9].mxu1  ;;  %v2186_v45 = vadd.f32 %v2056_v18, %v2045_v8 }
 0x162   : > { %783 = vst [vmem:[%s2069_s25 + $0x18] sm:$0xff] %v1556_v44  ;;  %v516_v51 = vadd.f32 %v515_v48, %v2045_v8  ;;  %v517_v52 = vpop.f32.mrb[10].mxu0  ;;  %v2102_v53 = vpop.f32.mrb[10].mxu1 }
 0x163   : > { %v801_v55 = vadd.f32 %v784_v50, %v514_v47  ;;  %v518_v56 = vadd.f32 %v517_v52, %v2043_v7  ;;  %v519_v57 = vpop.f32.mrb[11].mxu0  ;;  %v2106_v58 = vpop.f32.mrb[11].mxu1  ;;  %v2190_v47 = vadd.f32 %v2072_v28, %v2043_v7  ;;  %v2198_v52 = vadd.f32 %v2075_v31, %v2045_v8 }
 0x164   : > { %v2109_v60 = vadd.f32 %v785_v54, %v516_v51  ;;  %v520_v61 = vadd.f32 %v519_v57, %v2045_v8 }
 0x165   : > { %v2113_v63 = vadd.f32 %v786_v59, %v518_v56  ;;  %vm809_vm8 = vcmp.ge.f32.partialorder %v801_v55, 1.0  ;;  %v2205_v59 = vadd.f32 %v2079_v34, %v2043_v7 }
 0x166   : > { %v2115_v1 = vadd.f32 %v787_v62, %v520_v61  ;;  %v817_v2 = vsel %vm809_vm8, 1.0, %v1823_v19  ;;  %vm810_vm9 = vcmp.ge.f32.partialorder %v2109_v60, 1.0  ;;  %v854_v54 = vsel %vm809_vm8, 0.0, %v801_v55 }
 0x167   : > { %v818_v3 = vsel %vm810_vm9, 1.0, %v1823_v19  ;;  %vm811_vm10 = vcmp.ge.f32.partialorder %v2113_v63, 1.0  ;;  %v855_v62 = vsel %vm810_vm9, 0.0, %v2109_v60 }
 0x168   : > { %v523_v4 = vpop.f32.mrb[12].mxu0  ;;  %v1557_v5 = vpack.c.bf16 %v818_v3, %v817_v2  ;;  %v819_v6 = vsel %vm811_vm10, 1.0, %v1823_v19  ;;  %vm812_vm11 = vcmp.ge.f32.partialorder %v2115_v1, 1.0  ;;  %v2128_v9 = vpop.f32.mrb[12].mxu1  ;;  %v2213_v3 = vadd.f32 %v2082_v37, %v2045_v8 }
 0x169   : > { %v524_v10 = vadd.f32 %v523_v4, %v2043_v7  ;;  %v525_v11 = vpop.f32.mrb[13].mxu0  ;;  %v820_v13 = vsel %vm812_vm11, 1.0, %v1823_v19  ;;  %v2134_v14 = vpop.f32.mrb[13].mxu1  ;;  %v2229_v37 = vadd.f32 %v2097_v49, %v2045_v8  ;;  %v2245_v49 = vadd.f32 %v2128_v9, %v2043_v7 }
 0x16a   : > { %v526_v17 = vadd.f32 %v525_v11, %v2045_v8  ;;  %v527_v20 = vpop.f32.mrb[14].mxu0  ;;  %1494 = vst [vmem:[%s2069_s25 + $0x20] sm:$0xff] %v1557_v5  ;;  %v1558_v21 = vpack.c.bf16 %v820_v13, %v819_v6  ;;  %v2139_v22 = vpop.f32.mrb[14].mxu1  ;;  %v856_v5 = vsel %vm811_vm10, 0.0, %v2113_v63  ;;  %v2222_v6 = vadd.f32 %v2094_v46, %v2043_v7 }
 0x16b   : > { %v2142_v24 = vadd.f32 %v788_v16, %v524_v10  ;;  %v528_v25 = vadd.f32 %v527_v20, %v2043_v7  ;;  %v529_v26 = vpop.f32.mrb[15].mxu0  ;;  %v2145_v27 = vpop.f32.mrb[15].mxu1  ;;  %v857_v10 = vsel %vm812_vm11, 0.0, %v2115_v1  ;;  %v2235_v13 = vadd.f32 %v2102_v53, %v2043_v7 }
 0x16c   : > { %v2148_v33 = vadd.f32 %v789_v23, %v526_v17  ;;  %v530_v29 = vadd.f32 %v529_v26, %v2045_v8  ;;  %1495 = vst [vmem:[%s2069_s25 + $0x28] sm:$0xff] %v1558_v21  ;;  %v2239_v46 = vadd.f32 %v2106_v58, %v2045_v8  ;;  %v2251_v58 = vadd.f32 %v2134_v14, %v2045_v8 }
 0x16d   : > { %v2153_v38 = vadd.f32 %v790_v30, %v528_v25  ;;  %vm813_vm12 = vcmp.ge.f32.partialorder %v2142_v24, 1.0  ;;  %v2255_v21 = vadd.f32 %v2139_v22, %v2043_v7 }
 0x16e   : > { %v2156_v32 = vadd.f32 %v791_v36, %v530_v29  ;;  %v821_v40 = vsel %vm813_vm12, 1.0, %v1823_v19  ;;  %vm814_vm13 = vcmp.ge.f32.partialorder %v2148_v33, 1.0  ;;  %v858_v30 = vsel %vm813_vm12, 0.0, %v2142_v24 }
 0x16f   : > { %v822_v39 = vsel %vm814_vm13, 1.0, %v1823_v19  ;;  %vm815_vm14 = vcmp.ge.f32.partialorder %v2153_v38, 1.0  ;;  %v2265_v29 = vadd.f32 %v2145_v27, %v2045_v8 }
 0x170   : > { %v533_v43 = vpop.f32.mrb[16].mxu0  ;;  %v1559_v44 = vpack.c.bf16 %v822_v39, %v821_v40  ;;  %v823_v0 = vsel %vm815_vm14, 1.0, %v1823_v19  ;;  %vm816_vm15 = vcmp.ge.f32.partialorder %v2156_v32, 1.0  ;;  %v2182_v12 = vpop.f32.mrb[16].mxu1  ;;  %v860_v24 = vsel %vm815_vm14, 0.0, %v2153_v38 }
 0x171   : > { %v534_v15 = vadd.f32 %v533_v43, %v2043_v7  ;;  %v535_v48 = vpop.f32.mrb[17].mxu0  ;;  %v824_v50 = vsel %vm816_vm15, 1.0, %v1823_v19  ;;  %v615_v51 = vpop.f32.mrb[17].mxu1  ;;  %v859_v43 = vsel %vm814_vm13, 0.0, %v2148_v33 }
 0x172   : > { %v536_v18 = vadd.f32 %v535_v48, %v2045_v8  ;;  %v537_v56 = vpop.f32.mrb[18].mxu0  ;;  %1496 = vst [vmem:[%s2069_s25 + $0x30] sm:$0xff] %v1559_v44  ;;  %v1560_v28 = vpack.c.bf16 %v824_v50, %v823_v0  ;;  %v617_v57 = vpop.f32.mrb[18].mxu1  ;;  %v861_v50 = vsel %vm816_vm15, 0.0, %v2156_v32 }
 0x173   : > { %v871_v61 = vadd.f32 %v854_v54, %v534_v15  ;;  %v538_v31 = vadd.f32 %v537_v56, %v2043_v7  ;;  %v539_v2 = vpop.f32.mrb[19].mxu0  ;;  %v619_v55 = vpop.f32.mrb[19].mxu1  ;;  %v2284_v54 = vadd.f32 %v2182_v12, %v2043_v7  ;;  %v2291_v38 = vadd.f32 %v617_v57, %v2043_v7 }
 0x174   : > { %v872_v4 = vadd.f32 %v855_v62, %v536_v18  ;;  %v540_v34 = vadd.f32 %v539_v2, %v2045_v8  ;;  %1497 = vst [vmem:[%s2069_s25 + $0x38] sm:$0xff] %v1560_v28  ;;  %v2288_v18 = vadd.f32 %v615_v51, %v2045_v8  ;;  %v2294_v28 = vadd.f32 %v619_v55, %v2045_v8 }
 0x175   : > { %v873_v60 = vadd.f32 %v856_v5, %v538_v31  ;;  %vm879_vm0 = vcmp.ge.f32.partialorder %v871_v61, 1.0 }
 0x176   : > { %v874_v11 = vadd.f32 %v857_v10, %v540_v34  ;;  %v887_v63 = vsel %vm879_vm0, 1.0, %v1823_v19  ;;  %vm880_vm1 = vcmp.ge.f32.partialorder %v872_v4, 1.0  ;;  %v924_v12 = vsel %vm879_vm0, 0.0, %v871_v61 }
 0x177   : > { %v888_v1 = vsel %vm880_vm1, 1.0, %v1823_v19  ;;  %vm881_vm2 = vcmp.ge.f32.partialorder %v873_v60, 1.0  ;;  %v925_v62 = vsel %vm880_vm1, 0.0, %v872_v4 }
 0x178   : > { %v543_v16 = vpop.f32.mrb[20].mxu0  ;;  %v1561_v17 = vpack.c.bf16 %v888_v1, %v887_v63  ;;  %v889_v20 = vsel %vm881_vm2, 1.0, %v1823_v19  ;;  %vm882_vm3 = vcmp.ge.f32.partialorder %v874_v11, 1.0  ;;  %v623_v53 = vpop.f32.mrb[20].mxu1  ;;  %v926_v57 = vsel %vm881_vm2, 0.0, %v873_v60 }
 0x179   : > { %v544_v23 = vadd.f32 %v543_v16, %v2043_v7  ;;  %v545_v9 = vpop.f32.mrb[21].mxu0  ;;  %v890_v25 = vsel %vm882_vm3, 1.0, %v1823_v19  ;;  %v625_v26 = vpop.f32.mrb[21].mxu1  ;;  %v927_v61 = vsel %vm882_vm3, 0.0, %v874_v11  ;;  %v2308_v4 = vadd.f32 %v623_v53, %v2043_v7 }
 0x17a   : > { %v546_v14 = vadd.f32 %v545_v9, %v2045_v8  ;;  %v547_v22 = vpop.f32.mrb[22].mxu0  ;;  %1502 = vst [vmem:[%s2069_s25 + $0x40] sm:$0xff] %v1561_v17  ;;  %v1562_v36 = vpack.c.bf16 %v890_v25, %v889_v20  ;;  %v627_v40 = vpop.f32.mrb[22].mxu1  ;;  %v2314_v17 = vadd.f32 %v625_v26, %v2045_v8 }
 0x17b   : > { %v875_v39 = vadd.f32 %v858_v30, %v544_v23  ;;  %v548_v44 = vadd.f32 %v547_v22, %v2043_v7  ;;  %v549_v27 = vpop.f32.mrb[23].mxu0  ;;  %v2276_v0 = vpop.f32.mrb[23].mxu1  ;;  %v2317_v20 = vadd.f32 %v627_v40, %v2043_v7 }
 0x17c   : > { %v876_v15 = vadd.f32 %v859_v43, %v546_v14  ;;  %v550_v48 = vadd.f32 %v549_v27, %v2045_v8  ;;  %1503 = vst [vmem:[%s2069_s25 + $0x48] sm:$0xff] %v1562_v36 }
 0x17d   : > { %v877_v33 = vadd.f32 %v860_v24, %v548_v44  ;;  %vm883_vm4 = vcmp.ge.f32.partialorder %v875_v39, 1.0 }
 0x17e   : > { %v878_v56 = vadd.f32 %v861_v50, %v550_v48  ;;  %v891_v32 = vsel %vm883_vm4, 1.0, %v1823_v19  ;;  %vm884_vm5 = vcmp.ge.f32.partialorder %v876_v15, 1.0  ;;  %v928_v30 = vsel %vm883_vm4, 0.0, %v875_v39 }
 0x17f   : > { %v892_v51 = vsel %vm884_vm5, 1.0, %v1823_v19  ;;  %vm885_vm6 = vcmp.ge.f32.partialorder %v877_v33, 1.0  ;;  %v929_v14 = vsel %vm884_vm5, 0.0, %v876_v15 }
 0x180   : > { %v553_v31 = vpop.f32.mrb[24].mxu0  ;;  %v1563_v2 = vpack.c.bf16 %v892_v51, %v891_v32  ;;  %v893_v55 = vsel %vm885_vm6, 1.0, %v1823_v19  ;;  %vm886_vm7 = vcmp.ge.f32.partialorder %v878_v56, 1.0  ;;  %v633_v5 = vpop.f32.mrb[24].mxu1  ;;  %v930_v43 = vsel %vm885_vm6, 0.0, %v877_v33 }
 0x181   : > { %v554_v34 = vadd.f32 %v553_v31, %v2043_v7  ;;  %v555_v10 = vpop.f32.mrb[25].mxu0  ;;  %v894_v63 = vsel %vm886_vm7, 1.0, %v1823_v19  ;;  %v635_v1 = vpop.f32.mrb[25].mxu1  ;;  %v2329_v40 = vsel %vm886_vm7, 0.0, %v878_v56  ;;  %v2332_v24 = vadd.f32 %v633_v5, %v2043_v7 }
 0x182   : > { %v556_v60 = vadd.f32 %v555_v10, %v2045_v8  ;;  %v557_v16 = vpop.f32.mrb[26].mxu0  ;;  %1504 = vst [vmem:[%s2069_s25 + $0x50] sm:$0xff] %v1563_v2  ;;  %v1564_v23 = vpack.c.bf16 %v894_v63, %v893_v55  ;;  %v637_v11 = vpop.f32.mrb[26].mxu1  ;;  %v2335_v39 = vadd.f32 %v635_v1, %v2045_v8 }
 0x183   : > { %v941_v9 = vadd.f32 %v924_v12, %v554_v34  ;;  %v558_v53 = vadd.f32 %v557_v16, %v2043_v7  ;;  %v559_v25 = vpop.f32.mrb[27].mxu0  ;;  %v2323_v22 = vpop.f32.mrb[27].mxu1 }
 0x184   : > { %v942_v36 = vadd.f32 %v925_v62, %v556_v60  ;;  %v560_v26 = vadd.f32 %v559_v25, %v2045_v8  ;;  %1505 = vst [vmem:[%s2069_s25 + $0x58] sm:$0xff] %v1564_v23 }
 0x185   : > { %vm949_vm8 = vcmp.ge.f32.partialorder %v941_v9, 1.0  ;;  %v943_v44 = vadd.f32 %v926_v57, %v558_v53 }
 0x186   : > { %v957_v27 = vsel %vm949_vm8, 1.0, %v1823_v19  ;;  %v994_v15 = vsel %vm949_vm8, 0.0, %v941_v9  ;;  %vm950_vm9 = vcmp.ge.f32.partialorder %v942_v36, 1.0  ;;  %v944_v48 = vadd.f32 %v927_v61, %v560_v26 }
 0x187   : > { %v1011_v50 = vadd.f32 %v994_v15, %v2164_v35  ;;  %v958_v33 = vsel %vm950_vm9, 1.0, %v1823_v19  ;;  %v995_v32 = vsel %vm950_vm9, 0.0, %v942_v36  ;;  %vm951_vm10 = vcmp.ge.f32.partialorder %v943_v44, 1.0 }
 0x188   : > { %v1565_v56 = vpack.c.bf16 %v958_v33, %v957_v27  ;;  %v1012_v12 = vadd.f32 %v995_v32, %v2168_v41  ;;  %v959_v62 = vsel %vm951_vm10, 1.0, %v1823_v19  ;;  %v996_v51 = vsel %vm951_vm10, 0.0, %v943_v44  ;;  %v563_v31 = vpop.f32.mrb[28].mxu0  ;;  %v2342_v57 = vpop.f32.mrb[28].mxu1 }
 0x189   : > { %vm1019_vm11 = vcmp.ge.f32.partialorder %v1011_v50, 1.0  ;;  %v1013_v2 = vadd.f32 %v996_v51, %v2176_v42  ;;  %vm952_vm12 = vcmp.ge.f32.partialorder %v944_v48, 1.0  ;;  %v564_v35 = vadd.f32 %v563_v31, %v2043_v7  ;;  %v565_v55 = vpop.f32.mrb[29].mxu0  ;;  %v2346_v5 = vpop.f32.mrb[29].mxu1 }
 0x18a   : > { %v1027_v34 = vsel %vm1019_vm11, 1.0, %v1823_v19  ;;  %v1064_v10 = vsel %vm1019_vm11, 0.0, %v1011_v50  ;;  %1510 = vst [vmem:[%s2069_s25 + $0x60] sm:$0xff] %v1565_v56  ;;  %vm1020_vm13 = vcmp.ge.f32.partialorder %v1012_v12, 1.0  ;;  %v960_v41 = vsel %vm952_vm12, 1.0, %v1823_v19  ;;  %v567_v61 = vpop.f32.mrb[30].mxu0 }
 0x18b   : > { %v2352_v63 = vpop.f32.mrb[30].mxu1  ;;  %v1028_v42 = vsel %vm1020_vm13, 1.0, %v1823_v19  ;;  %v1065_v1 = vsel %vm1020_vm13, 0.0, %v1012_v12  ;;  %vm1021_vm14 = vcmp.ge.f32.partialorder %v1013_v2, 1.0  ;;  %v1566_v60 = vpack.c.bf16 %v960_v41, %v959_v62  ;;  %v569_v16 = vpop.f32.mrb[31].mxu0 }
 0x18c   : > { %v2355_v23 = vpop.f32.mrb[31].mxu1  ;;  %v1569_v9 = vpack.c.bf16 %v1028_v42, %v1027_v34  ;;  %v1066_v53 = vsel %vm1021_vm14, 0.0, %v1013_v2  ;;  %v997_v25 = vsel %vm952_vm12, 0.0, %v944_v48  ;;  %v2359_v36 = vadd.f32 %v637_v11, %v2043_v7 }
 0x18d   : > { %1511 = vst [vmem:[%s2069_s25 + $0x68] sm:$0xff] %v1566_v60  ;;  %v1014_v26 = vadd.f32 %v997_v25, %v2186_v45  ;;  %v945_v44 = vadd.f32 %v928_v30, %v564_v35  ;;  %v566_v27 = vadd.f32 %v565_v55, %v2045_v8  ;;  %v568_v15 = vadd.f32 %v567_v61, %v2043_v7 }
 0x18e   : > { %1518 = vst [vmem:[%s2069_s25 + $0x80] sm:$0xff] %v1569_v9  ;;  %v1029_v50 = vsel %vm1021_vm14, 1.0, %v1823_v19  ;;  %v1081_v33 = vadd.f32 %v1064_v10, %v2222_v6  ;;  %v1082_v32 = vadd.f32 %v1065_v1, %v2229_v37  ;;  %v2370_v48 = vadd.f32 %v1066_v53, %v2235_v13 }
 0x18f   : > { %vm1022_vm15 = vcmp.ge.f32.partialorder %v1014_v26, 1.0  ;;  %vm953_vm0 = vcmp.ge.f32.partialorder %v945_v44, 1.0  ;;  %v946_v11 = vadd.f32 %v929_v14, %v566_v27  ;;  %v947_v45 = vadd.f32 %v930_v43, %v568_v15 }
 0x190   : > { %v1030_v30 = vsel %vm1022_vm15, 1.0, %v1823_v19  ;;  %v961_v56 = vsel %vm953_vm0, 1.0, %v1823_v19  ;;  %v998_v12 = vsel %vm953_vm0, 0.0, %v945_v44  ;;  %v570_v62 = vadd.f32 %v569_v16, %v2045_v8 }
 0x191   : > { %v1570_v51 = vpack.c.bf16 %v1030_v30, %v1029_v50  ;;  %v1015_v6 = vadd.f32 %v998_v12, %v2190_v47  ;;  %vm954_vm1 = vcmp.ge.f32.partialorder %v946_v11, 1.0  ;;  %vm955_vm2 = vcmp.ge.f32.partialorder %v947_v45, 1.0 }
 0x192   : > { %v962_v37 = vsel %vm954_vm1, 1.0, %v1823_v19  ;;  %v999_v13 = vsel %vm954_vm1, 0.0, %v946_v11  ;;  %v1000_v14 = vsel %vm955_vm2, 0.0, %v947_v45  ;;  %v2381_v43 = vadd.f32 %v2323_v22, %v2045_v8 }
 0x193   : > { %1519 = vst [vmem:[%s2069_s25 + $0x88] sm:$0xff] %v1570_v51  ;;  %vm1023_vm3 = vcmp.ge.f32.partialorder %v1015_v6, 1.0  ;;  %v1567_v31 = vpack.c.bf16 %v962_v37, %v961_v56  ;;  %v1016_v2 = vadd.f32 %v999_v13, %v2198_v52  ;;  %v1017_v35 = vadd.f32 %v1000_v14, %v2205_v59 }
 0x194   : > { %v1067_v47 = vsel %vm1022_vm15, 0.0, %v1014_v26  ;;  %v1031_v55 = vsel %vm1023_vm3, 1.0, %v1823_v19  ;;  %v948_v34 = vadd.f32 %v2329_v40, %v570_v62  ;;  %vm1089_vm4 = vcmp.ge.f32.partialorder %v1081_v33, 1.0 }
 0x195   : > { %v1068_v10 = vsel %vm1023_vm3, 0.0, %v1015_v6  ;;  %1512 = vst [vmem:[%s2069_s25 + $0x70] sm:$0xff] %v1567_v31  ;;  %vm1024_vm5 = vcmp.ge.f32.partialorder %v1016_v2, 1.0  ;;  %v963_v22 = vsel %vm955_vm2, 1.0, %v1823_v19  ;;  %v1134_v41 = vsel %vm1089_vm4, 0.0, %v1081_v33 }
 0x196   : > { %v1032_v61 = vsel %vm1024_vm5, 1.0, %v1823_v19  ;;  %v1069_v52 = vsel %vm1024_vm5, 0.0, %v1016_v2  ;;  %vm1025_vm6 = vcmp.ge.f32.partialorder %v1017_v35, 1.0  ;;  %v1097_v59 = vsel %vm1089_vm4, 1.0, %v1823_v19 }
 0x197   : > { %v1571_v42 = vpack.c.bf16 %v1032_v61, %v1031_v55  ;;  %vm956_vm7 = vcmp.ge.f32.partialorder %v948_v34, 1.0  ;;  %v1151_v40 = vadd.f32 %v1134_v41, %v2284_v54  ;;  %vm1090_vm8 = vcmp.ge.f32.partialorder %v1082_v32, 1.0 }
 0x198   : > { %v964_v1 = vsel %vm956_vm7, 1.0, %v1823_v19  ;;  %v1001_v60 = vsel %vm956_vm7, 0.0, %v948_v34  ;;  %v1098_v16 = vsel %vm1090_vm8, 1.0, %v1823_v19  ;;  %v1135_v9 = vsel %vm1090_vm8, 0.0, %v1082_v32 }
 0x199   : > { %1520 = vst [vmem:[%s2069_s25 + $0x90] sm:$0xff] %v1571_v42  ;;  %v1568_v53 = vpack.c.bf16 %v964_v1, %v963_v22  ;;  %v1018_v25 = vadd.f32 %v1001_v60, %v2213_v3  ;;  %vm1159_vm9 = vcmp.ge.f32.partialorder %v1151_v40, 1.0  ;;  %v1573_v26 = vpack.c.bf16 %v1098_v16, %v1097_v59 }
 0x19a   : > { %v1033_v44 = vsel %vm1025_vm6, 1.0, %v1823_v19  ;;  %v1204_v27 = vsel %vm1159_vm9, 0.0, %v1151_v40  ;;  %v1152_v54 = vadd.f32 %v1135_v9, %v2288_v18  ;;  %vm1091_vm10 = vcmp.ge.f32.partialorder %v2370_v48, 1.0 }
 0x19b   : > { %1513 = vst [vmem:[%s2069_s25 + $0x78] sm:$0xff] %v1568_v53  ;;  %vm1026_vm11 = vcmp.ge.f32.partialorder %v1018_v25, 1.0  ;;  %v1167_v15 = vsel %vm1159_vm9, 1.0, %v1823_v19  ;;  %v1221_v50 = vadd.f32 %v1204_v27, %v2332_v24  ;;  %1526 = vst [vmem:[%s2069_s25 + $0xa0] sm:$0xff] %v1573_v26  ;;  %v1136_v3 = vsel %vm1091_vm10, 0.0, %v2370_v48 }
 0x19c   : > { %v1070_v33 = vsel %vm1025_vm6, 0.0, %v1017_v35  ;;  %v1034_v32 = vsel %vm1026_vm11, 1.0, %v1823_v19  ;;  %vm1160_vm12 = vcmp.ge.f32.partialorder %v1152_v54, 1.0  ;;  %v1153_v18 = vadd.f32 %v1136_v3, %v2291_v38 }
 0x19d   : > { %v1572_v11 = vpack.c.bf16 %v1034_v32, %v1033_v44  ;;  %vm1229_vm13 = vcmp.ge.f32.partialorder %v1221_v50, 1.0  ;;  %v1168_v45 = vsel %vm1160_vm12, 1.0, %v1823_v19  ;;  %v1205_v30 = vsel %vm1160_vm12, 0.0, %v1152_v54 }
 0x19e   : > { %v1577_v24 = vpack.c.bf16 %v1168_v45, %v1167_v15  ;;  %v1222_v56 = vadd.f32 %v1205_v30, %v2335_v39  ;;  %v1099_v12 = vsel %vm1091_vm10, 1.0, %v1823_v19  ;;  %vm1161_vm14 = vcmp.ge.f32.partialorder %v1153_v18, 1.0 }
 0x19f   : > { %1521 = vst [vmem:[%s2069_s25 + $0x98] sm:$0xff] %v1572_v11  ;;  %v1071_v62 = vsel %vm1026_vm11, 0.0, %v1018_v25  ;;  %v1237_v51 = vsel %vm1229_vm13, 1.0, %v1823_v19  ;;  %v1206_v6 = vsel %vm1161_vm14, 0.0, %v1153_v18  ;;  %v1084_v38 = vadd.f32 %v1067_v47, %v2239_v46 }
 0x1a0   : > { %1534 = vst [vmem:[%s2069_s25 + $0xc0] sm:$0xff] %v1577_v24  ;;  %vm1230_vm15 = vcmp.ge.f32.partialorder %v1222_v56, 1.0  ;;  %v1169_v37 = vsel %vm1161_vm14, 1.0, %v1823_v19  ;;  %v1223_v39 = vadd.f32 %v1206_v6, %v2359_v36  ;;  %v1085_v13 = vadd.f32 %v1068_v10, %v2245_v49 }
 0x1a1   : > { %v1238_v48 = vsel %vm1230_vm15, 1.0, %v1823_v19  ;;  %vm1092_vm0 = vcmp.ge.f32.partialorder %v1084_v38, 1.0  ;;  %v644_v14 = vadd.f32 %v2342_v57, %v2043_v7  ;;  %v1086_v31 = vadd.f32 %v1069_v52, %v2251_v58 }
 0x1a2   : > { %v1581_v2 = vpack.c.bf16 %v1238_v48, %v1237_v51  ;;  %v1100_v46 = vsel %vm1092_vm0, 1.0, %v1823_v19  ;;  %v1137_v35 = vsel %vm1092_vm0, 0.0, %v1084_v38  ;;  %v646_v47 = vadd.f32 %v2346_v5, %v2045_v8 }
 0x1a3   : > { %vm1231_vm1 = vcmp.ge.f32.partialorder %v1223_v39, 1.0  ;;  %v1574_v36 = vpack.c.bf16 %v1100_v46, %v1099_v12  ;;  %v1154_v49 = vadd.f32 %v1137_v35, %v2294_v28  ;;  %vm1093_vm2 = vcmp.ge.f32.partialorder %v1085_v13, 1.0 }
 0x1a4   : > { %1542 = vst [vmem:[%s2069_s25 + $0xe0] sm:$0xff] %v1581_v2  ;;  %v1101_v55 = vsel %vm1093_vm2, 1.0, %v1823_v19  ;;  %v1138_v34 = vsel %vm1093_vm2, 0.0, %v1085_v13  ;;  %vm1094_vm3 = vcmp.ge.f32.partialorder %v1086_v31, 1.0  ;;  %v1087_v57 = vadd.f32 %v1070_v33, %v2255_v21 }
 0x1a5   : > { %1527 = vst [vmem:[%s2069_s25 + $0xa8] sm:$0xff] %v1574_v36  ;;  %vm1162_vm4 = vcmp.ge.f32.partialorder %v1154_v49, 1.0  ;;  %v1155_v58 = vadd.f32 %v1138_v34, %v2308_v4  ;;  %v1102_v5 = vsel %vm1094_vm3, 1.0, %v1823_v19  ;;  %v1139_v10 = vsel %vm1094_vm3, 0.0, %v1086_v31 }
 0x1a6   : > { %v1170_v22 = vsel %vm1162_vm4, 1.0, %v1823_v19  ;;  %v1207_v28 = vsel %vm1162_vm4, 0.0, %v1154_v49  ;;  %v1575_v41 = vpack.c.bf16 %v1102_v5, %v1101_v55  ;;  %v1156_v61 = vadd.f32 %v1139_v10, %v2314_v17 }
 0x1a7   : > { %v1578_v52 = vpack.c.bf16 %v1170_v22, %v1169_v37  ;;  %v1224_v59 = vadd.f32 %v1207_v28, %v2381_v43  ;;  %vm1163_vm5 = vcmp.ge.f32.partialorder %v1155_v58, 1.0  ;;  %vm1095_vm6 = vcmp.ge.f32.partialorder %v1087_v57, 1.0 }
 0x1a8   : > { %v1239_v21 = vsel %vm1231_vm1, 1.0, %v1823_v19  ;;  %v1171_v4 = vsel %vm1163_vm5, 1.0, %v1823_v19  ;;  %v1208_v42 = vsel %vm1163_vm5, 0.0, %v1155_v58  ;;  %1528 = vst [vmem:[%s2069_s25 + $0xb0] sm:$0xff] %v1575_v41  ;;  %vm1164_vm7 = vcmp.ge.f32.partialorder %v1156_v61, 1.0 }
 0x1a9   : > { %1535 = vst [vmem:[%s2069_s25 + $0xc8] sm:$0xff] %v1578_v52  ;;  %vm1232_vm8 = vcmp.ge.f32.partialorder %v1224_v59, 1.0  ;;  %v1225_v40 = vadd.f32 %v1208_v42, %v644_v14  ;;  %v1172_v17 = vsel %vm1164_vm7, 1.0, %v1823_v19  ;;  %v1209_v1 = vsel %vm1164_vm7, 0.0, %v1156_v61 }
 0x1aa   : > { %v1240_v43 = vsel %vm1232_vm8, 1.0, %v1823_v19  ;;  %v1579_v60 = vpack.c.bf16 %v1172_v17, %v1171_v4  ;;  %v1226_v16 = vadd.f32 %v1209_v1, %v646_v47  ;;  %v1140_v9 = vsel %vm1095_vm6, 0.0, %v1087_v57 }
 0x1ab   : > { %v1582_v53 = vpack.c.bf16 %v1240_v43, %v1239_v21  ;;  %vm1233_vm9 = vcmp.ge.f32.partialorder %v1225_v40, 1.0  ;;  %v1157_v25 = vadd.f32 %v1140_v9, %v2317_v20  ;;  %v1088_v44 = vadd.f32 %v1071_v62, %v2265_v29 }
 0x1ac   : > { %v1241_v26 = vsel %vm1233_vm9, 1.0, %v1823_v19  ;;  %1536 = vst [vmem:[%s2069_s25 + $0xd0] sm:$0xff] %v1579_v60  ;;  %vm1234_vm10 = vcmp.ge.f32.partialorder %v1226_v16, 1.0  ;;  %v648_v54 = vadd.f32 %v2352_v63, %v2043_v7  ;;  %v1103_v15 = vsel %vm1095_vm6, 1.0, %v1823_v19 }
 0x1ad   : > { %1543 = vst [vmem:[%s2069_s25 + $0xe8] sm:$0xff] %v1582_v53  ;;  %v1242_v27 = vsel %vm1234_vm10, 1.0, %v1823_v19  ;;  %vm1165_vm11 = vcmp.ge.f32.partialorder %v1157_v25, 1.0  ;;  %v630_v20 = vadd.f32 %v2276_v0, %v2045_v8  ;;  %vm1096_vm12 = vcmp.ge.f32.partialorder %v1088_v44, 1.0 }
 0x1ae   : > { %v1583_v50 = vpack.c.bf16 %v1242_v27, %v1241_v26  ;;  %v1210_v3 = vsel %vm1165_vm11, 0.0, %v1157_v25  ;;  %v1104_v29 = vsel %vm1096_vm12, 1.0, %v1823_v19  ;;  %v1141_v32 = vsel %vm1096_vm12, 0.0, %v1088_v44 }
 0x1af   : > { %v1227_v33 = vadd.f32 %v1210_v3, %v648_v54  ;;  %v1576_v18 = vpack.c.bf16 %v1104_v29, %v1103_v15  ;;  %v1158_v7 = vadd.f32 %v1141_v32, %v630_v20  ;;  %v1173_v63 = vsel %vm1165_vm11, 1.0, %v1823_v19 }
 0x1b0   : > { %1544 = vst [vmem:[%s2069_s25 + $0xf0] sm:$0xff] %v1583_v50  ;;  %v650_v11 = vadd.f32 %v2355_v23, %v2045_v8 }
 0x1b1   : > { %vm1235_vm13 = vcmp.ge.f32.partialorder %v1227_v33, 1.0  ;;  %1529 = vst [vmem:[%s2069_s25 + $0xb8] sm:$0xff] %v1576_v18  ;;  %vm1166_vm14 = vcmp.ge.f32.partialorder %v1158_v7, 1.0 }
 0x1b2   : > { %v1174_v0 = vsel %vm1166_vm14, 1.0, %v1823_v19  ;;  %v1211_v45 = vsel %vm1166_vm14, 0.0, %v1158_v7  ;;  %v1243_v56 = vsel %vm1235_vm13, 1.0, %v1823_v19 }
 0x1b3   : > { %v1580_v30 = vpack.c.bf16 %v1174_v0, %v1173_v63  ;;  %v1228_v24 = vadd.f32 %v1211_v45, %v650_v11 }
 0x1b5   : > { %1537 = vst [vmem:[%s2069_s25 + $0xd8] sm:$0xff] %v1580_v30  ;;  %vm1236_vm15 = vcmp.ge.f32.partialorder %v1228_v24, 1.0 }
 0x1b6   : > { %v1244_v12 = vsel %vm1236_vm15, 1.0, %v1823_v19 }
 0x1b7   : > { %v1584_v62 = vpack.c.bf16 %v1244_v12, %v1243_v56 }
 0x1b9   : > { %1545 = vst [vmem:[%s2069_s25 + $0xf8] sm:$0xff] %v1584_v62 }
 0x1ba   : > { %s1586_s7 = sshll.u32 %s1803_s15, 9  ;;  %s1326_s4 = sshll.u32 %s2069_s25, 4  ;;  %s1327_s4 = int_to_ptr.vmem [resolvable:$true] %s1326_s4 }
 0x1bb   : > { %s1309_s6 = scalar_lea.hbm %s2521_s3, %s1586_s7  ;;  %s1824_s8 = smov 512  }
 0x1bc   : > { %p2541_p11 = scmp.ne.s32.totalorder %s2532_s26, 0  ;;  %s1825_s5 = smov 1024  }
 0x1bd   : > { %s1826_s9 = smov 4   ;;  %s1827_s10 = smov 128  }
 0x1be   : > { %1616 = sst [smem:[#allocation13]] (%p2541_p11), %s1824_s8  ;;  %s1828_s15 = smov 8  }
 0x1bf   : > { %1617 = sst [smem:[#allocation13 + $0x1]] (%p2541_p11), %s1825_s5  ;;  %s1829_s11 = smov [#allocation12]  }
 0x1c0   : > { %1618 = sst [smem:[#allocation13 + $0x2]] (%p2541_p11), %s1826_s9  ;;  %s1830_s18 = smov 0  }
 0x1c1   : > { %1619 = sst [smem:[#allocation13 + $0x3]] (%p2541_p11), %s1827_s10 }
 0x1c2   : > { %1620 = sst [smem:[#allocation13 + $0x4]] (%p2541_p11), %s1827_s10 }
 0x1c3   : > { %1621 = sst [smem:[#allocation13 + $0x5]] (%p2541_p11), %s1828_s15 }
 0x1c4   : > { %1622 = dma.general (%p2541_p11), %s1327_s4, 4096, %s1309_s6, %s1291_s29, %s1829_s11, [#allocation13], %s1830_s18, 0  }
 0x1c5 PF: > { %s1354_s1 = sand.u32 1, %s1791_s12   ;;  %p2542_p0 = scmp.ne.s32.totalorder %s2533_s28, 0 }
 0x1c6   : > { %s1355_s21 = scalar_lea.sflag [#allocation6], %s1354_s1 }
 0x1c7   : > { %p1629_p2 = pnand %p1460_p3, %p2542_p0 }
 0x1c9   : > { %1786 = dma.done.wait (!%p1629_p2), %s1355_s21, 4096  }
 0x1ca   : > { %1788 = vsyncadd (!%p1629_p2), %s1355_s21, 4294963200  ;;  %s20_s17 = sadd.s32 1, %s1811_s17   ;;  %s2543_s12 = smov %s1795_s13 }
 0x1cb   : > { %p17_p6 = scmp.ge.s32.totalorder %s20_s17, 4   ;;  %s2544_s13 = smov %s1799_s14 }
 0x1cc   : > { %s2545_s14 = smov %s1913_s27  ;;  %s2546_s15 = smov %s1807_s16 }
 0x1cd   : > { %s2547_s16 = smov %s2549_s20  ;;  %19 = sbr.rel (!%p17_p6) target bundleno = 9 (0x9), region = 113 }
 0x1d4   :  { %1360 = vsyncpa [#allocation5], 1 }
 0x1d5   :  { %1362 = vsyncpa [#allocation5 + $0x1], 1 }
 0x1d6   :  { %1363 = vsyncpa [#allocation8], 1 }
 0x1d7   :  { %1364 = vsyncpa [#allocation6], 1 }
 0x1d8   :  { %1366 = vsyncpa [#allocation6 + $0x1], 1 }

</bundles_post_ra>
